<compile_context>
chip_gen: v5e
topology: v5e:2x2
jax: 0.10.0
libtpu: 0.0.40
codegen_flags: <defaults>
</compile_context>

<pallas_src>
import jax
import jax.numpy as jnp
from jax import lax
from jax.experimental import pallas as pl
from jax.experimental.pallas import tpu as pltpu

LANE = 128
SUBLANE = 8
SMOOTH = 0.01


def _round_down(x, m):
    return (x // m) * m


def _hw_budgets():
    """(target HBM bytes per input block, vmem_limit_bytes), generation-aware."""
    target, vmem_limit = 2 * 1024 * 1024, 32 * 1024 * 1024     # safe on v5e/v6e/v7x
    try:
        cap = int(pltpu.get_tpu_info().vmem_capacity_bytes)
        if cap >= 100 * 1024 * 1024:                           # 128 MiB VMEM: v5e/v6e
            target, vmem_limit = 4 * 1024 * 1024, 64 * 1024 * 1024
    except Exception:
        pass
    return target, vmem_limit


def _pick_tiles(B, Cmax, Nr, itemsize, target_bytes):
    """Choose (TB, TR):
       * larger-input block bytes (TB*Cmax*TR*128*itemsize) ~ target_bytes
       * TR is a multiple of 8, or TR == Nr (full extent)
       * TB divides B, and TB*TR is "foldable": (TB*TR) % 8 == 0 or TB*TR <= 8
    """
    row_bytes = Cmax * LANE * itemsize
    trmax = max(1, target_bytes // row_bytes)

    def best_divisor(max_tb, ok=lambda d: True):
        best = 1
        for d in range(1, B + 1):
            if B % d == 0 and d <= max_tb and ok(d):
                best = d
        return best

    if Nr <= SUBLANE:
        TR = Nr
        max_tb = max(1, target_bytes // (TR * row_bytes))
        TB = best_divisor(max_tb,
                          lambda d: (d * TR) % SUBLANE == 0 or d * TR <= SUBLANE)
    elif trmax >= Nr:
        TR = Nr if Nr % SUBLANE == 0 else _round_down(Nr, SUBLANE)
        max_tb = max(1, target_bytes // (TR * row_bytes))
        TB = best_divisor(max_tb)
    else:
        TR = max(SUBLANE, _round_down(trmax, SUBLANE))
        TB = 1
    return TB, TR


def _make_kernel(nj, TB, TR, Nr, fold):
    tail_rows = Nr - (nj - 1) * TR            # valid rows in the last j-tile
    has_tail = tail_rows != TR
    grp = (TB * TR) // SUBLANE if fold else 1

    def kernel(yt_ref, yp_ref, omin_ref, omax_ref, accmin, accmax):
        j = pl.program_id(1)

        @pl.when(j == 0)
        def _init():
            accmin[...] = jnp.zeros_like(accmin)
            accmax[...] = jnp.zeros_like(accmax)

        yt = yt_ref[...]                                    # (TB, Ct, TR, LANE)
        yp = yp_ref[...]                                    # (TB, Cp, TR, LANE)

        # Channel reduce over a major axis (pure VPU), in the native dtype;
        # only the reduced (TB, TR, LANE) slab is cast to f32.
        mn_t, mx_t = jnp.min(yt, axis=1), jnp.max(yt, axis=1)
        mn_p, mx_p = jnp.min(yp, axis=1), jnp.max(yp, axis=1)
        if yt.dtype == yp.dtype:
            mn = jnp.minimum(mn_t, mn_p).astype(jnp.float32)
            mx = jnp.maximum(mx_t, mx_p).astype(jnp.float32)
        else:
            mn = jnp.minimum(mn_t.astype(jnp.float32), mn_p.astype(jnp.float32))
            mx = jnp.maximum(mx_t.astype(jnp.float32), mx_p.astype(jnp.float32))

        def _accum(mn_v, mx_v):
            if fold:
                accmin[...] += jnp.sum(mn_v.reshape(grp, SUBLANE, LANE), axis=0)
                accmax[...] += jnp.sum(mx_v.reshape(grp, SUBLANE, LANE), axis=0)
            else:
                accmin[...] += mn_v
                accmax[...] += mx_v

        if has_tail:
            @pl.when(j == nj - 1)
            def _masked():
                row = lax.broadcasted_iota(jnp.int32, (TB, TR, LANE), 1)
                valid = row < tail_rows
                _accum(jnp.where(valid, mn, 0.0), jnp.where(valid, mx, 0.0))

            @pl.when(j != nj - 1)
            def _bulk():
                _accum(mn, mx)
        else:
            _accum(mn, mx)

        @pl.when(j == nj - 1)
        def _write():
            omin_ref[...] = accmin[...][None]
            omax_ref[...] = accmax[...][None]

    return kernel


def ovl(y_true, y_pred):
    """Pallas implementation of Ovl.forward(y_true, y_pred) -> scalar f32."""
    assert y_true.ndim >= 2 and y_pred.ndim >= 2
    assert y_true.shape[0] == y_pred.shape[0], "batch dims must match"
    assert y_true.shape[2:] == y_pred.shape[2:], "spatial dims must match"

    B, Ct = y_true.shape[0], y_true.shape[1]
    Cp = y_pred.shape[1]
    Cmax = max(Ct, Cp)

    N = 1
    for d in y_true.shape[2:]:
        N *= d

    yt = y_true.reshape(B, Ct, N)
    yp = y_pred.reshape(B, Cp, N)

    pad = (-N) % LANE
    if pad:
        # Zero-padding is exact: at a padded location every channel of both
        # tensors is 0, so min = max = 0 and nothing is added to either sum.
        # TODO(synk): this is one extra HBM copy of each input for
        # non-128-divisible spatial sizes; add a zero-copy in-kernel ragged
        # path if such shapes dominate.
        yt = jnp.pad(yt, ((0, 0), (0, 0), (0, pad)))
        yp = jnp.pad(yp, ((0, 0), (0, 0), (0, pad)))
    Nr = (N + pad) // LANE

    yt = yt.reshape(B, Ct, Nr, LANE)
    yp = yp.reshape(B, Cp, Nr, LANE)

    itemsize = max(jnp.dtype(y_true.dtype).itemsize, jnp.dtype(y_pred.dtype).itemsize)
    target_bytes, vmem_limit = _hw_budgets()
    TB, TR = _pick_tiles(B, Cmax, Nr, itemsize, target_bytes)

    nbi = B // TB
    nj = pl.cdiv(Nr, TR)
    fold = (TB * TR) % SUBLANE == 0

    if fold:
        acc_shape = (SUBLANE, LANE)
        out_struct = jax.ShapeDtypeStruct((nbi, SUBLANE, LANE), jnp.float32)
        out_spec = pl.BlockSpec((1, SUBLANE, LANE), lambda i, j: (i, 0, 0))
    else:  # tiny blocks: TB*TR <= 8, accumulate directly (no fold needed)
        acc_shape = (TB, TR, LANE)
        out_struct = jax.ShapeDtypeStruct((nbi, TB, TR, LANE), jnp.float32)
        out_spec = pl.BlockSpec((1, TB, TR, LANE), lambda i, j: (i, 0, 0, 0))

    omin, omax = pl.pallas_call(
        _make_kernel(nj, TB, TR, Nr, fold),
        out_shape=(out_struct, out_struct),
        grid_spec=pltpu.PrefetchScalarGridSpec(
            num_scalar_prefetch=0,
            grid=(nbi, nj),
            in_specs=[
                pl.BlockSpec((TB, Ct, TR, LANE), lambda i, j: (i, 0, j, 0)),
                pl.BlockSpec((TB, Cp, TR, LANE), lambda i, j: (i, 0, j, 0)),
            ],
            out_specs=[out_spec, out_spec],
            scratch_shapes=[
                pltpu.VMEM(acc_shape, jnp.float32),
                pltpu.VMEM(acc_shape, jnp.float32),
            ],
        ),
        compiler_params=pltpu.CompilerParams(
            dimension_semantics=("parallel", "arbitrary"),
            vmem_limit_bytes=vmem_limit,
        ),
    )(yt, yp)

    num = jnp.sum(omin, dtype=jnp.float32)
    den = jnp.sum(omax, dtype=jnp.float32)
    return (num + SMOOTH) / (den + SMOOTH)


def ovl_ref(y_true, y_pred):
    concat = jnp.concatenate(
        [y_true.astype(jnp.float32), y_pred.astype(jnp.float32)], axis=1)
    mn = jnp.min(concat, axis=1)
    mx = jnp.max(concat, axis=1)
    return (jnp.sum(mn) + SMOOTH) / (jnp.sum(mx) + SMOOTH)


def _check(y_true, y_pred, tol):
    out = jax.block_until_ready(ovl(y_true, y_pred))
    ref = jax.block_until_ready(ovl_ref(y_true, y_pred))
    assert jnp.allclose(out, ref, rtol=tol, atol=tol), (out, ref)


if __name__ == "__main__":
    key = jax.random.PRNGKey(0)
    ks = jax.random.split(key, 10)

    # 1) NCHW, N divisible by 128 (batch-packed tiny-block path).
    y_true = (jax.random.uniform(ks[0], (2, 4, 16, 16)) > 0.5).astype(jnp.float32)
    y_pred = jax.random.uniform(ks[1], (2, 4, 16, 16), dtype=jnp.float32)
    _check(y_true, y_pred, 1e-5)

    # 2) Spatial size not divisible by 128 (zero-pad path).
    y_true2 = (jax.random.uniform(ks[2], (2, 1, 15, 15)) > 0.5).astype(jnp.float32)
    y_pred2 = jax.random.uniform(ks[3], (2, 1, 15, 15), dtype=jnp.float32)
    _check(y_true2, y_pred2, 1e-5)

    # 3) bf16 inputs (itemsize-aware sizing + native-dtype reduce).
    y_true3 = jax.random.uniform(ks[4], (2, 3, 16, 16), dtype=jnp.bfloat16)
    y_pred3 = jax.random.uniform(ks[5], (2, 3, 16, 16), dtype=jnp.bfloat16)
    _check(y_true3, y_pred3, 1e-4)

    # 4) Larger Nr -> (8,128)-folded accumulator path.
    y_true4 = (jax.random.uniform(ks[6], (2, 2, 32, 64)) > 0.5).astype(jnp.float32)
    y_pred4 = jax.random.uniform(ks[7], (2, 2, 32, 64), dtype=jnp.float32)
    _check(y_true4, y_pred4, 1e-5)

    # 5) Nr not a multiple of 8 -> gated tail-mask path.
    y_true5 = (jax.random.uniform(ks[8], (2, 2, 9, 128)) > 0.5).astype(jnp.float32)
    y_pred5 = jax.random.uniform(ks[9], (2, 2, 9, 128), dtype=jnp.float32)
    _check(y_true5, y_pred5, 1e-5)

    print("KERNEL_OK")
</pallas_src>

<mosaic_0001>
module attributes {stable_mosaic.version = 11 : i64} {
  func.func @kernel(%arg0: i32, %arg1: i32, %arg2: memref<2x4x2x128xf32, #tpu.memory_space<vmem>>, %arg3: memref<2x4x2x128xf32, #tpu.memory_space<vmem>>, %arg4: memref<1x2x2x128xf32, #tpu.memory_space<vmem>>, %arg5: memref<1x2x2x128xf32, #tpu.memory_space<vmem>>, %arg6: memref<2x2x128xf32, #tpu.memory_space<vmem>>, %arg7: memref<2x2x128xf32, #tpu.memory_space<vmem>>) attributes {dimension_semantics = [#tpu.dimension_semantics<parallel>, #tpu.dimension_semantics<arbitrary>], iteration_bounds = array<i64: 1, 1>, scalar_prefetch = 0 : i64, scratch_operands = 2 : i64, tpu.core_type = #tpu.core_type<tc>, window_params = [{transform_indices = @transform_0, window_bounds = array<i64: 2, 4, 2, 128>}, {transform_indices = @transform_1, window_bounds = array<i64: 2, 4, 2, 128>}, {transform_indices = @transform_2, window_bounds = array<i64: 1, 2, 2, 128>}, {transform_indices = @transform_3, window_bounds = array<i64: 1, 2, 2, 128>}]} {
    %c0_i32 = arith.constant 0 : i32
    %0 = arith.cmpi eq, %arg1, %c0_i32 : i32
    %1 = arith.extui %0 : i1 to i32
    %c0_i32_0 = arith.constant 0 : i32
    %2 = arith.cmpi ne, %1, %c0_i32_0 : i32
    scf.if %2 {
      %cst_25 = arith.constant 0.000000e+00 : f32
      %20 = vector.broadcast %cst_25 : f32 to vector<2x2x128xf32>
      %c0_26 = arith.constant 0 : index
      %c0_27 = arith.constant 0 : index
      %c0_28 = arith.constant 0 : index
      %21 = vector.load %arg6[%c0_26, %c0_27, %c0_28] : memref<2x2x128xf32, #tpu.memory_space<vmem>>, vector<2x2x128xf32>
      tpu.vector_store %arg6[%c0_26, %c0_27, %c0_28], %20 {strides = array<i32>} : memref<2x2x128xf32, #tpu.memory_space<vmem>>, vector<2x2x128xf32>,
      %cst_29 = arith.constant 0.000000e+00 : f32
      %22 = vector.broadcast %cst_29 : f32 to vector<2x2x128xf32>
      %c0_30 = arith.constant 0 : index
      %c0_31 = arith.constant 0 : index
      %c0_32 = arith.constant 0 : index
      %23 = vector.load %arg7[%c0_30, %c0_31, %c0_32] : memref<2x2x128xf32, #tpu.memory_space<vmem>>, vector<2x2x128xf32>
      tpu.vector_store %arg7[%c0_30, %c0_31, %c0_32], %22 {strides = array<i32>} : memref<2x2x128xf32, #tpu.memory_space<vmem>>, vector<2x2x128xf32>,
    } else {
    }
    %c0 = arith.constant 0 : index
    %c0_1 = arith.constant 0 : index
    %c0_2 = arith.constant 0 : index
    %c0_3 = arith.constant 0 : index
    %3 = vector.load %arg2[%c0, %c0_1, %c0_2, %c0_3] : memref<2x4x2x128xf32, #tpu.memory_space<vmem>>, vector<2x4x2x128xf32>
    %c0_4 = arith.constant 0 : index
    %c0_5 = arith.constant 0 : index
    %c0_6 = arith.constant 0 : index
    %c0_7 = arith.constant 0 : index
    %4 = vector.load %arg3[%c0_4, %c0_5, %c0_6, %c0_7] : memref<2x4x2x128xf32, #tpu.memory_space<vmem>>, vector<2x4x2x128xf32>
    %cst = arith.constant dense<0x7F800000> : vector<2x2x128xf32>
    %5 = vector.multi_reduction <minimumf>, %3, %cst [1] : vector<2x4x2x128xf32> to vector<2x2x128xf32>
    %cst_8 = arith.constant dense<0xFF800000> : vector<2x2x128xf32>
    %6 = vector.multi_reduction <maximumf>, %3, %cst_8 [1] : vector<2x4x2x128xf32> to vector<2x2x128xf32>
    %cst_9 = arith.constant dense<0x7F800000> : vector<2x2x128xf32>
    %7 = vector.multi_reduction <minimumf>, %4, %cst_9 [1] : vector<2x4x2x128xf32> to vector<2x2x128xf32>
    %cst_10 = arith.constant dense<0xFF800000> : vector<2x2x128xf32>
    %8 = vector.multi_reduction <maximumf>, %4, %cst_10 [1] : vector<2x4x2x128xf32> to vector<2x2x128xf32>
    %9 = arith.minimumf %5, %7 : vector<2x2x128xf32>
    %10 = arith.maximumf %6, %8 : vector<2x2x128xf32>
    %c0_11 = arith.constant 0 : index
    %c0_12 = arith.constant 0 : index
    %c0_13 = arith.constant 0 : index
    %11 = vector.load %arg6[%c0_11, %c0_12, %c0_13] : memref<2x2x128xf32, #tpu.memory_space<vmem>>, vector<2x2x128xf32>
    %12 = arith.addf %11, %9 : vector<2x2x128xf32>
    %c0_14 = arith.constant 0 : index
    %c0_15 = arith.constant 0 : index
    %c0_16 = arith.constant 0 : index
    %13 = vector.load %arg6[%c0_14, %c0_15, %c0_16] : memref<2x2x128xf32, #tpu.memory_space<vmem>>, vector<2x2x128xf32>
    tpu.vector_store %arg6[%c0_14, %c0_15, %c0_16], %12 {strides = array<i32>} : memref<2x2x128xf32, #tpu.memory_space<vmem>>, vector<2x2x128xf32>,
    %c0_17 = arith.constant 0 : index
    %c0_18 = arith.constant 0 : index
    %c0_19 = arith.constant 0 : index
    %14 = vector.load %arg7[%c0_17, %c0_18, %c0_19] : memref<2x2x128xf32, #tpu.memory_space<vmem>>, vector<2x2x128xf32>
    %15 = arith.addf %14, %10 : vector<2x2x128xf32>
    %c0_20 = arith.constant 0 : index
    %c0_21 = arith.constant 0 : index
    %c0_22 = arith.constant 0 : index
    %16 = vector.load %arg7[%c0_20, %c0_21, %c0_22] : memref<2x2x128xf32, #tpu.memory_space<vmem>>, vector<2x2x128xf32>
    tpu.vector_store %arg7[%c0_20, %c0_21, %c0_22], %15 {strides = array<i32>} : memref<2x2x128xf32, #tpu.memory_space<vmem>>, vector<2x2x128xf32>,
    %c0_i32_23 = arith.constant 0 : i32
    %17 = arith.cmpi eq, %arg1, %c0_i32_23 : i32
    %18 = arith.extui %17 : i1 to i32
    %c0_i32_24 = arith.constant 0 : i32
    %19 = arith.cmpi ne, %18, %c0_i32_24 : i32
    scf.if %19 {
      %c0_25 = arith.constant 0 : index
      %c0_26 = arith.constant 0 : index
      %c0_27 = arith.constant 0 : index
      %20 = vector.load %arg6[%c0_25, %c0_26, %c0_27] : memref<2x2x128xf32, #tpu.memory_space<vmem>>, vector<2x2x128xf32>
      %21 = vector.shape_cast %20 : vector<2x2x128xf32> to vector<1x2x2x128xf32>
      %c0_28 = arith.constant 0 : index
      %c0_29 = arith.constant 0 : index
      %c0_30 = arith.constant 0 : index
      %c0_31 = arith.constant 0 : index
      %22 = vector.load %arg4[%c0_28, %c0_29, %c0_30, %c0_31] : memref<1x2x2x128xf32, #tpu.memory_space<vmem>>, vector<1x2x2x128xf32>
      tpu.vector_store %arg4[%c0_28, %c0_29, %c0_30, %c0_31], %21 {strides = array<i32>} : memref<1x2x2x128xf32, #tpu.memory_space<vmem>>, vector<1x2x2x128xf32>,
      %c0_32 = arith.constant 0 : index
      %c0_33 = arith.constant 0 : index
      %c0_34 = arith.constant 0 : index
      %23 = vector.load %arg7[%c0_32, %c0_33, %c0_34] : memref<2x2x128xf32, #tpu.memory_space<vmem>>, vector<2x2x128xf32>
      %24 = vector.shape_cast %23 : vector<2x2x128xf32> to vector<1x2x2x128xf32>
      %c0_35 = arith.constant 0 : index
      %c0_36 = arith.constant 0 : index
      %c0_37 = arith.constant 0 : index
      %c0_38 = arith.constant 0 : index
      %25 = vector.load %arg5[%c0_35, %c0_36, %c0_37, %c0_38] : memref<1x2x2x128xf32, #tpu.memory_space<vmem>>, vector<1x2x2x128xf32>
      tpu.vector_store %arg5[%c0_35, %c0_36, %c0_37, %c0_38], %24 {strides = array<i32>} : memref<1x2x2x128xf32, #tpu.memory_space<vmem>>, vector<1x2x2x128xf32>,
    } else {
    }
    return
  }
  func.func @transform_0(%arg0: i32, %arg1: i32) -> (i32, i32, i32, i32) {
    %c0_i32 = arith.constant 0 : i32
    %c0_i32_0 = arith.constant 0 : i32
    %c0_i32_1 = arith.constant 0 : i32
    return %arg0, %c0_i32, %arg1, %c0_i32_0 : i32, i32, i32, i32
  }
  func.func @transform_1(%arg0: i32, %arg1: i32) -> (i32, i32, i32, i32) {
    %c0_i32 = arith.constant 0 : i32
    %c0_i32_0 = arith.constant 0 : i32
    %c0_i32_1 = arith.constant 0 : i32
    return %arg0, %c0_i32, %arg1, %c0_i32_0 : i32, i32, i32, i32
  }
  func.func @transform_2(%arg0: i32, %arg1: i32) -> (i32, i32, i32, i32) {
    %c0_i32 = arith.constant 0 : i32
    %c0_i32_0 = arith.constant 0 : i32
    %c0_i32_1 = arith.constant 0 : i32
    %c0_i32_2 = arith.constant 0 : i32
    return %arg0, %c0_i32, %c0_i32_0, %c0_i32_1 : i32, i32, i32, i32
  }
  func.func @transform_3(%arg0: i32, %arg1: i32) -> (i32, i32, i32, i32) {
    %c0_i32 = arith.constant 0 : i32
    %c0_i32_0 = arith.constant 0 : i32
    %c0_i32_1 = arith.constant 0 : i32
    %c0_i32_2 = arith.constant 0 : i32
    return %arg0, %c0_i32, %c0_i32_0, %c0_i32_1 : i32, i32, i32, i32
  }
}

</mosaic_0001>

<bundles_post_ra>
// kernel: tpu_custom_call.1
= control target key start
LH: loop header
LB: loop body
LE: loop exit
PB: predicated region body
PF: predicated region fallthrough
CT: control target
= control target key end

     0   :  { %9 = vsyncpa [#allocation5], 0  ;;  %s387_s0 = inlined_call_operand.hbm [shape: f32[2,4,2,128], index: 0, kind: input, shape index: {}]   ;;  %s388_s1 = inlined_call_operand.hbm [shape: f32[2,4,2,128], index: 1, kind: input, shape index: {}]   ;;  %s389_s2 = inlined_call_operand.hbm [shape: f32[1,2,2,128], index: 2, kind: output, shape index: {0}]   ;;  %s390_s3 = inlined_call_operand.hbm [shape: f32[1,2,2,128], index: 3, kind: output, shape index: {1}]  }
   0x1   :  { %10 = vsyncpa [#allocation8], 0 }
   0x2   :  { %11 = vsyncpa [#allocation6], 0 }
   0x3   :  { %12 = vsyncpa [#allocation11], 0  ;;  %s17_s14 = sshll.u32 %s387_s0, 4  ;;  %s304_s15 = smov [#allocation4]   ;;  %s18_s14 = int_to_ptr.hbm [resolvable:$true] %s17_s14 }
   0x4   :  { %s19_s16 = sshll.u32 %s304_s15, 4  ;;  %s30_s19 = sshll.u32 %s388_s1, 4  ;;  %s20_s16 = int_to_ptr.vmem [resolvable:$true] %s19_s16  ;;  %s31_s19 = int_to_ptr.hbm [resolvable:$true] %s30_s19 }
   0x5   :  { %s305_s20 = smov 32   ;;  %s306_s21 = smov 2  }
   0x6   :  { %25 = dma.hbm_to_vmem [thread:$0]  %s18_s14, 256, %s20_s16, [#allocation5], %s305_s20, %s305_s20, %s306_s21  }
   0x7   :  { %s307_s22 = smov [#allocation7]  }
   0x8   :  { %s32_s23 = sshll.u32 %s307_s22, 4  ;;  %s33_s23 = int_to_ptr.vmem [resolvable:$true] %s32_s23 }
   0x9   :  { %38 = dma.hbm_to_vmem [thread:$0]  %s31_s19, 256, %s33_s23, [#allocation8], %s305_s20, %s305_s20, %s306_s21  }
   0xa   :  { %296 = dma.done.wait [#allocation5], 256  }
   0xb   :  { %297 = vsyncadd [#allocation5], 4294967040 }
   0xc   :  { %298 = dma.done.wait [#allocation8], 256  }
   0xd   :  { %299 = vsyncadd [#allocation8], 4294967040  ;;  %v308_v0 = vmov 0.0   ;;  %vm71_vm0 = vcmask 1041408   ;;  %v55_v1 = vld [vmem:[#allocation4] sm:$0x3] }
   0xe   :  { %51 = vst [vmem:[#allocation2] sm:$0x3] %v308_v0  ;;  %v56_v2 = vld [vmem:[#allocation4 + $0x2] sm:$0x3]  ;;  %v57_v3 = vld [vmem:[#allocation4 + $0x4] sm:$0x3] }
   0xf   :  { %52 = vst [vmem:[#allocation2 + $0x2] sm:$0x3] %v308_v0  ;;  %v58_v4 = vld [vmem:[#allocation4 + $0x6] sm:$0x3]  ;;  %v63_v5 = vld [vmem:[#allocation7] sm:$0x3] }
  0x10   :  { %53 = vst [vmem:[#allocation3] sm:$0x3] %v308_v0  ;;  %v64_v6 = vld [vmem:[#allocation7 + $0x2] sm:$0x3]  ;;  %v65_v7 = vld [vmem:[#allocation7 + $0x4] sm:$0x3] }
  0x11   :  { %54 = vst [vmem:[#allocation3 + $0x2] sm:$0x3] %v308_v0  ;;  %v66_v8 = vld [vmem:[#allocation7 + $0x6] sm:$0x3]  ;;  %v72_v9 = vsel %vm71_vm0, %v55_v1, inf  ;;  %v73_v10 = vsel %vm71_vm0, %v56_v2, inf }
  0x12   :  { %v74_v11 = vsel %vm71_vm0, %v57_v3, inf  ;;  %v76_v12 = vsel %vm71_vm0, %v58_v4, inf  ;;  %v100_v13 = vsel %vm71_vm0, %v63_v5, inf  ;;  %v101_v14 = vsel %vm71_vm0, %v64_v6, inf  ;;  %v59_v19 = vld [vmem:[#allocation4 + $0x8] sm:$0x3] }
  0x13   :  { %v75_v15 = vmin.f32 %v72_v9, %v74_v11  ;;  %v77_v16 = vmin.f32 %v73_v10, %v76_v12  ;;  %v102_v17 = vsel %vm71_vm0, %v65_v7, inf  ;;  %v104_v18 = vsel %vm71_vm0, %v66_v8, inf  ;;  %v60_v20 = vld [vmem:[#allocation4 + $0xa] sm:$0x3]  ;;  %v61_v23 = vld [vmem:[#allocation4 + $0xc] sm:$0x3] }
  0x14   :  { %v103_v21 = vmin.f32 %v100_v13, %v102_v17  ;;  %v105_v22 = vmin.f32 %v101_v14, %v104_v18  ;;  %v62_v24 = vld [vmem:[#allocation4 + $0xe] sm:$0x3]  ;;  %v67_v25 = vld [vmem:[#allocation7 + $0x8] sm:$0x3]  ;;  %v68_v27 = vld [vmem:[#allocation7 + $0xa] sm:$0x3] }
  0x15   :  { %v78_v26 = vmin.f32 %v75_v15, %v77_v16  ;;  %v69_v28 = vld [vmem:[#allocation7 + $0xc] sm:$0x3]  ;;  %v70_v29 = vld [vmem:[#allocation7 + $0xe] sm:$0x3]  ;;  %v79_v31 = vsel %vm71_vm0, %v59_v19, inf  ;;  %v80_v32 = vsel %vm71_vm0, %v60_v20, inf }
  0x16   :  { %v106_v30 = vmin.f32 %v103_v21, %v105_v22  ;;  %v81_v33 = vsel %vm71_vm0, %v61_v23, inf  ;;  %v132_v34 = vld [vmem:[#allocation2] sm:$0x3]  ;;  %v83_v36 = vsel %vm71_vm0, %v62_v24, inf  ;;  %v107_v37 = vsel %vm71_vm0, %v67_v25, inf  ;;  %s309_s0 = smov [#allocation9]  }
  0x17   :  { %v82_v35 = vmin.f32 %v79_v31, %v81_v33  ;;  %v108_v38 = vsel %vm71_vm0, %v68_v27, inf  ;;  %v84_v40 = vmin.f32 %v80_v32, %v83_v36  ;;  %v109_v41 = vsel %vm71_vm0, %v69_v28, inf  ;;  %v133_v52 = vld [vmem:[#allocation2 + $0x2] sm:$0x3]  ;;  %v138_v9 = vld [vmem:[#allocation3] sm:$0x3] }
  0x18   :  { %v128_v39 = vmin.f32 %v78_v26, %v106_v30  ;;  %v111_v42 = vsel %vm71_vm0, %v70_v29, inf  ;;  %v110_v43 = vmin.f32 %v107_v37, %v109_v41  ;;  %v86_v45 = vsel %vm71_vm0, %v55_v1, -inf  ;;  %v139_v18 = vld [vmem:[#allocation3 + $0x2] sm:$0x3]  ;;  %s159_s1 = sshll.u32 %s309_s0, 4  ;;  %s161_s26 = sshll.u32 %s389_s2, 4  ;;  %s160_s1 = int_to_ptr.vmem [resolvable:$true] %s159_s1  ;;  %s162_s26 = int_to_ptr.hbm [resolvable:$true] %s161_s26 }
  0x19   :  { %v112_v44 = vmin.f32 %v108_v38, %v111_v42  ;;  %v87_v46 = vsel %vm71_vm0, %v56_v2, -inf  ;;  %v85_v48 = vmin.f32 %v82_v35, %v84_v40  ;;  %v88_v49 = vsel %vm71_vm0, %v57_v3, -inf  ;;  %s310_s27 = smov [#allocation10]   ;;  %s174_s4 = sshll.u32 %s390_s3, 4  ;;  %s175_s4 = int_to_ptr.hbm [resolvable:$true] %s174_s4 }
  0x1a   :  { %v134_v47 = vadd.f32 %v132_v34, %v128_v39  ;;  %v90_v50 = vsel %vm71_vm0, %v58_v4, -inf  ;;  %v89_v53 = vmax.f32 %v86_v45, %v88_v49  ;;  %v114_v55 = vsel %vm71_vm0, %v63_v5, -inf  ;;  %s172_s28 = sshll.u32 %s310_s27, 4  ;;  %s173_s28 = int_to_ptr.vmem [resolvable:$true] %s172_s28 }
  0x1b   :  { %v113_v51 = vmin.f32 %v110_v43, %v112_v44  ;;  %v91_v54 = vmax.f32 %v87_v46, %v90_v50  ;;  %v115_v56 = vsel %vm71_vm0, %v64_v6, -inf  ;;  %v116_v57 = vsel %vm71_vm0, %v65_v7, -inf }
  0x1c   :  { %136 = vst [vmem:[#allocation2] sm:$0x3] %v134_v47  ;;  %v118_v58 = vsel %vm71_vm0, %v66_v8, -inf  ;;  %v93_v59 = vsel %vm71_vm0, %v59_v19, -inf  ;;  %v117_v62 = vmax.f32 %v114_v55, %v116_v57  ;;  %v94_v0 = vsel %vm71_vm0, %v60_v20, -inf }
  0x1d   :  { %v129_v60 = vmin.f32 %v85_v48, %v113_v51  ;;  %v92_v61 = vmax.f32 %v89_v53, %v91_v54  ;;  %v119_v63 = vmax.f32 %v115_v56, %v118_v58  ;;  %v95_v1 = vsel %vm71_vm0, %v61_v23, -inf }
  0x1e   :  { %v97_v2 = vsel %vm71_vm0, %v62_v24, -inf  ;;  %v121_v3 = vsel %vm71_vm0, %v67_v25, -inf  ;;  %v96_v6 = vmax.f32 %v93_v59, %v95_v1  ;;  %v122_v8 = vsel %vm71_vm0, %v68_v27, -inf }
  0x1f   :  { %v135_v4 = vadd.f32 %v133_v52, %v129_v60  ;;  %v120_v5 = vmax.f32 %v117_v62, %v119_v63  ;;  %v98_v7 = vmax.f32 %v94_v0, %v97_v2  ;;  %v123_v10 = vsel %vm71_vm0, %v69_v28, -inf }
  0x20   :  { %v125_v11 = vsel %vm71_vm0, %v70_v29, -inf  ;;  %v124_v14 = vmax.f32 %v121_v3, %v123_v10 }
  0x21   :  { %137 = vst [vmem:[#allocation2 + $0x2] sm:$0x3] %v135_v4  ;;  %v130_v12 = vmax.f32 %v92_v61, %v120_v5  ;;  %v99_v13 = vmax.f32 %v96_v6, %v98_v7  ;;  %v126_v15 = vmax.f32 %v122_v8, %v125_v11 }
  0x23   :  { %v140_v16 = vadd.f32 %v138_v9, %v130_v12  ;;  %v127_v17 = vmax.f32 %v124_v14, %v126_v15 }
  0x25   :  { %142 = vst [vmem:[#allocation3] sm:$0x3] %v140_v16  ;;  %v131_v19 = vmax.f32 %v99_v13, %v127_v17 }
  0x27   :  { %v141_v20 = vadd.f32 %v139_v18, %v131_v19 }
  0x28   :  { %v147_v21 = vld [vmem:[#allocation2] sm:$0xf]  }
  0x29   :  { %143 = vst [vmem:[#allocation3 + $0x2] sm:$0x3] %v141_v20 }
  0x2a   :  { %149 = vst [vmem:[#allocation9] sm:$0xf] %v147_v21  }
  0x2b   :  { %167 = dma.vmem_to_hbm [thread:$0]  %s160_s1, 64, %s162_s26, [#allocation6], %s305_s20, %s305_s20, %s306_s21  }
  0x30   :  { %v151_v22 = vld [vmem:[#allocation3] sm:$0xf]  }
  0x31   :  { %153 = vst [vmem:[#allocation10] sm:$0xf] %v151_v22  }
  0x32   :  { %180 = dma.vmem_to_hbm [thread:$0]  %s173_s28, 64, %s175_s4, [#allocation11], %s305_s20, %s305_s20, %s306_s21  }
  0x33   :  { %300 = dma.done.wait [#allocation6], 64  }
  0x34   :  { %301 = vsyncadd [#allocation6], 4294967232 }
  0x35   :  { %302 = dma.done.wait [#allocation11], 64  }
  0x36   :  { %303 = vsyncadd [#allocation11], 4294967232 }
  0x37   :  { %189 = vsyncpa [#allocation5], 1 }
  0x38   :  { %190 = vsyncpa [#allocation8], 1 }
  0x39   :  { %191 = vsyncpa [#allocation6], 1 }
  0x3a   :  { %192 = vsyncpa [#allocation11], 1 }

</bundles_post_ra>
